<compile_context>
chip_gen: v7x
topology: tpu7x:2x2x1
jax: 0.10.0
libtpu: 0.0.40
codegen_flags: <defaults>
</compile_context>

<pallas_src>
import jax
import jax.numpy as jnp
from jax.experimental import pallas as pl
from jax.experimental.pallas import tpu as pltpu

# ----------------------------- model config ---------------------------------
HALF_IN = 16          # half_in_size
LAYER_W = 32          # layer_width
NUM_CLS = 8           # num_classes
BATCH = 8
BN_EPS = 1e-5
DIN = 2 * HALF_IN     # full input width seen by forward()
PAD = 128             # lane-dense padding (vreg lane width / MXU granularity)
BIAS_LANE = DIN       # x_pad[:, BIAS_LANE] == 1.0 carries the folded biases


# ------------------------------- kernel -------------------------------------
def spinal_kernel(x_ref, w_ref, bfc_ref, o_ref):
    """SpinalVGGNet forward on one batch tile.

    x_ref   : (TB, PAD)  f32   lane-dense input: [xa | xb | 1.0 | zeros]
    w_ref   : (3, PAD, PAD) bf16
                [0] WA : input-half weights for all 4 layers (BN-folded,
                         half-selection baked into row placement, layer
                         biases in row BIAS_LANE, outputs in 32-lane blocks)
                [1] WB : block-superdiagonal prev-activation weights
                         (block k rows -> block k+1 cols), BN-folded
                [2] WFC: classifier over the [x1|x2|x3|x4] slab, cols 0:NUM_CLS
    bfc_ref : (1, PAD)   f32   FC bias row (cols >= NUM_CLS are 0)
    o_ref   : (TB, PAD)  f32   lane-dense output slab (cols >= NUM_CLS are 0)
    """
    bf16 = jnp.bfloat16
    f32 = jnp.float32

    x = x_ref[...].astype(bf16)                       # (TB, PAD)
    wa = w_ref[0]                                      # (PAD, PAD) bf16
    wb = w_ref[1]
    wfc = w_ref[2]

    # One dot produces the input-half contribution + folded bias of ALL four
    # spinal layers (block k of z belongs to layer k+1).
    z = jnp.dot(x, wa, preferred_element_type=f32)     # (TB, PAD) f32

    # Sequential spinal chain on the full slab.  WB only maps block k rows to
    # block k+1 cols, so after iteration k block k of h equals x_{k+1}; blocks
    # already correct are recomputed bit-identically, so no masking is needed.
    h = jnp.maximum(z, 0.0)                            # block 0 = x1
    for _ in range(3):                                 # blocks 1, 2, 3
        h = jnp.maximum(
            z + jnp.dot(h.astype(bf16), wb, preferred_element_type=f32), 0.0)

    # Classifier: single dot over the concatenated activation slab.
    o_ref[...] = (jnp.dot(h.astype(bf16), wfc, preferred_element_type=f32)
                  + bfc_ref[...])


# ------------------------------ wrapper --------------------------------------
def _pick_batch_tile(bsz):
    """>=2 grid steps for real batches (megacore), <=256 rows, multiple of 8."""
    if bsz <= 8:
        return bsz
    tb = max(8, min(256, (bsz // 2) // 8 * 8))
    while bsz % tb != 0:
        tb -= 8
    return tb


def spinal_vgg_net(x, packed, *, batch_tile=None):
    """Run the Pallas kernel. `packed` comes from pack_params()."""
    w, bfc = packed
    bsz, din = x.shape
    assert din == DIN
    assert bsz % 8 == 0, "batch must be a multiple of 8 (sublane tiling)"
    tb = batch_tile or _pick_batch_tile(bsz)
    assert tb % 8 == 0 and bsz % tb == 0, "batch_tile must be mult of 8 and divide batch"

    # Lane-dense input slab: [xa | xb | 1.0 | zeros]; the constant-1 lane makes
    # the folded layer biases ride the WA matmul.
    x_pad = jnp.zeros((bsz, PAD), jnp.float32)
    x_pad = x_pad.at[:, :DIN].set(x)
    x_pad = x_pad.at[:, BIAS_LANE].set(1.0)

    grid = (bsz // tb,)
    out = pl.pallas_call(
        spinal_kernel,
        out_shape=jax.ShapeDtypeStruct((bsz, PAD), jnp.float32),
        grid=grid,
        in_specs=[
            pl.BlockSpec((tb, PAD), lambda i: (i, 0)),          # x tile
            pl.BlockSpec((3, PAD, PAD), lambda i: (0, 0, 0)),   # weights (resident)
            pl.BlockSpec((1, PAD), lambda i: (0, 0)),           # FC bias
        ],
        out_specs=pl.BlockSpec((tb, PAD), lambda i: (i, 0)),
        compiler_params=pltpu.CompilerParams(
            dimension_semantics=("parallel",)),
    )(x_pad, w, bfc)
    return out[:, :NUM_CLS]


# -------------------------- parameter handling -------------------------------
def init_raw_params(key):
    """PyTorch-equivalent raw parameters (Linear + BatchNorm1d eval stats)."""
    ks = jax.random.split(key, 9)
    w1 = jax.random.normal(ks[0], (HALF_IN, LAYER_W), jnp.float32) * 0.1
    w234 = jax.random.normal(ks[1], (3, HALF_IN + LAYER_W, LAYER_W),
                             jnp.float32) * 0.1
    b = jax.random.normal(ks[2], (4, LAYER_W), jnp.float32) * 0.1
    gamma = 1.0 + 0.1 * jax.random.normal(ks[3], (4, LAYER_W), jnp.float32)
    beta = 0.1 * jax.random.normal(ks[4], (4, LAYER_W), jnp.float32)
    mean = jax.random.normal(ks[5], (4, LAYER_W), jnp.float32) * 0.05
    var = jnp.abs(jax.random.normal(ks[6], (4, LAYER_W), jnp.float32)) * 0.1 + 1.0
    wfc = jax.random.normal(ks[7], (4 * LAYER_W, NUM_CLS), jnp.float32) * 0.1
    bfc = jax.random.normal(ks[8], (NUM_CLS,), jnp.float32) * 0.1
    return dict(w1=w1, w234=w234, b=b, gamma=gamma, beta=beta, mean=mean,
                var=var, wfc=wfc, bfc=bfc)


def pack_params(p):
    """One-time prep: fold BN, bake half-selection + lane-block layout, bf16."""
    scale = p["gamma"] * jax.lax.rsqrt(p["var"] + BN_EPS)         # (4, LAYER_W)
    bias_fold = (p["b"] - p["mean"]) * scale + p["beta"]           # (4, LAYER_W)

    # A-side (input half) and B-side (previous activation) weights, BN-folded.
    a_w = [p["w1"] * scale[0]]
    b_w = []
    for k in range(3):
        a_w.append(p["w234"][k, :HALF_IN] * scale[k + 1])
        b_w.append(p["w234"][k, HALF_IN:] * scale[k + 1])

    # Layers 1,3 read x[:, 0:HALF_IN]; layers 2,4 read x[:, HALF_IN:2*HALF_IN].
    row_off = [0, HALF_IN, 0, HALF_IN]

    # WA: layer k's A-side weight occupies rows of its input half and the
    # 32-lane output block 32k:32k+32; row BIAS_LANE carries the folded bias.
    WA = jnp.zeros((PAD, PAD), jnp.float32)
    for k in range(4):
        c0 = k * LAYER_W
        WA = WA.at[row_off[k]:row_off[k] + HALF_IN, c0:c0 + LAYER_W].set(a_w[k])
        WA = WA.at[BIAS_LANE, c0:c0 + LAYER_W].set(bias_fold[k])

    # WB: block-superdiagonal; block k rows (x_{k+1}) feed block k+1 cols.
    WB = jnp.zeros((PAD, PAD), jnp.float32)
    for k in range(3):
        WB = WB.at[k * LAYER_W:(k + 1) * LAYER_W,
                   (k + 1) * LAYER_W:(k + 2) * LAYER_W].set(b_w[k])

    # WFC: single classifier weight over the [x1|x2|x3|x4] slab.
    WFC = jnp.zeros((PAD, PAD), jnp.float32)
    WFC = WFC.at[:4 * LAYER_W, :NUM_CLS].set(p["wfc"])

    w = jnp.stack([WA, WB, WFC]).astype(jnp.bfloat16)   # (3, PAD, PAD) bf16

    bfc = jnp.zeros((1, PAD), jnp.float32).at[0, :NUM_CLS].set(p["bfc"])
    return w, bfc


# ------------------------------ reference ------------------------------------
def reference(x, p):
    """Pure-JAX f32 reference on the UNFOLDED params (validates fold + kernel)."""
    h = HALF_IN

    def bn_relu(z, k):
        y = ((z - p["mean"][k]) / jnp.sqrt(p["var"][k] + BN_EPS)
             * p["gamma"][k] + p["beta"][k])
        return jnp.maximum(y, 0.0)

    xa, xb = x[:, :h], x[:, h:2 * h]
    x1 = bn_relu(xa @ p["w1"] + p["b"][0], 0)
    x2 = bn_relu(jnp.concatenate([xb, x1], 1) @ p["w234"][0] + p["b"][1], 1)
    x3 = bn_relu(jnp.concatenate([xa, x2], 1) @ p["w234"][1] + p["b"][2], 2)
    x4 = bn_relu(jnp.concatenate([xb, x3], 1) @ p["w234"][2] + p["b"][3], 3)
    feat = jnp.concatenate([x1, x2, x3, x4], 1)
    return feat @ p["wfc"] + p["bfc"]


if __name__ == "__main__":
    key = jax.random.PRNGKey(0)
    kx, kp = jax.random.split(key)
    x = jax.random.normal(kx, (BATCH, DIN), jnp.float32)

    raw = init_raw_params(kp)
    packed = pack_params(raw)   # one-time host-side prep (BN fold + packing)

    out = jax.block_until_ready(spinal_vgg_net(x, packed))
    ref = reference(x, raw)

    assert out.shape == (BATCH, NUM_CLS)
    # bf16 weights / dot operands (f32 accumulation) -> relaxed tolerance.
    max_err = float(jnp.max(jnp.abs(out - ref)))
    assert jnp.allclose(out, ref, atol=5e-2, rtol=5e-2), f"max abs err {max_err}"
    print("KERNEL_OK")
</pallas_src>

<mosaic_0001>
module attributes {stable_mosaic.version = 11 : i64} {
  func.func @spinal_kernel(%arg0: i32, %arg1: memref<8x128xf32, #tpu.memory_space<vmem>>, %arg2: memref<3x128x128xbf16, #tpu.memory_space<vmem>>, %arg3: memref<1x128xf32, #tpu.memory_space<vmem>>, %arg4: memref<8x128xf32, #tpu.memory_space<vmem>>) attributes {dimension_semantics = [#tpu.dimension_semantics<parallel>], iteration_bounds = array<i64: 1>, scalar_prefetch = 0 : i64, scratch_operands = 0 : i64, tpu.core_type = #tpu.core_type<tc>, window_params = [{transform_indices = @transform_0, window_bounds = array<i64: 8, 128>}, {pipeline_mode = #tpu.pipeline_mode<synchronous>, transform_indices = @transform_1, window_bounds = array<i64: 3, 128, 128>}, {pipeline_mode = #tpu.pipeline_mode<synchronous>, transform_indices = @transform_2, window_bounds = array<i64: 1, 128>}, {transform_indices = @transform_3, window_bounds = array<i64: 8, 128>}]} {
    %c0 = arith.constant 0 : index
    %c0_0 = arith.constant 0 : index
    %0 = vector.load %arg1[%c0, %c0_0] : memref<8x128xf32, #tpu.memory_space<vmem>>, vector<8x128xf32>
    %1 = arith.truncf %0 : vector<8x128xf32> to vector<8x128xbf16>
    %c0_1 = arith.constant 0 : index
    %c0_2 = arith.constant 0 : index
    %c0_3 = arith.constant 0 : index
    %2 = vector.load %arg2[%c0_1, %c0_2, %c0_3] : memref<3x128x128xbf16, #tpu.memory_space<vmem>>, vector<1x128x128xbf16>
    %3 = vector.shape_cast %2 : vector<1x128x128xbf16> to vector<128x128xbf16>
    %c1 = arith.constant 1 : index
    %c0_4 = arith.constant 0 : index
    %c0_5 = arith.constant 0 : index
    %4 = vector.load %arg2[%c1, %c0_4, %c0_5] : memref<3x128x128xbf16, #tpu.memory_space<vmem>>, vector<1x128x128xbf16>
    %5 = vector.shape_cast %4 : vector<1x128x128xbf16> to vector<128x128xbf16>
    %c2 = arith.constant 2 : index
    %c0_6 = arith.constant 0 : index
    %c0_7 = arith.constant 0 : index
    %6 = vector.load %arg2[%c2, %c0_6, %c0_7] : memref<3x128x128xbf16, #tpu.memory_space<vmem>>, vector<1x128x128xbf16>
    %7 = vector.shape_cast %6 : vector<1x128x128xbf16> to vector<128x128xbf16>
    %cst = arith.constant dense<0.000000e+00> : vector<8x128xf32>
    %8 = tpu.matmul %1, %3, %cst {dimension_numbers = #tpu.dot_dimension_numbers<[1], [0], [0], [1], [0, 0, 1, 1], [], []>} : vector<8x128xbf16>, vector<128x128xbf16>, vector<8x128xf32> -> vector<8x128xf32>
    %cst_8 = arith.constant 0.000000e+00 : f32
    %9 = vector.broadcast %cst_8 : f32 to vector<8x128xf32>
    %10 = arith.maximumf %8, %9 : vector<8x128xf32>
    %11 = arith.truncf %10 : vector<8x128xf32> to vector<8x128xbf16>
    %cst_9 = arith.constant dense<0.000000e+00> : vector<8x128xf32>
    %12 = tpu.matmul %11, %5, %cst_9 {dimension_numbers = #tpu.dot_dimension_numbers<[1], [0], [0], [1], [0, 0, 1, 1], [], []>} : vector<8x128xbf16>, vector<128x128xbf16>, vector<8x128xf32> -> vector<8x128xf32>
    %13 = arith.addf %8, %12 : vector<8x128xf32>
    %cst_10 = arith.constant 0.000000e+00 : f32
    %14 = vector.broadcast %cst_10 : f32 to vector<8x128xf32>
    %15 = arith.maximumf %13, %14 : vector<8x128xf32>
    %16 = arith.truncf %15 : vector<8x128xf32> to vector<8x128xbf16>
    %cst_11 = arith.constant dense<0.000000e+00> : vector<8x128xf32>
    %17 = tpu.matmul %16, %5, %cst_11 {dimension_numbers = #tpu.dot_dimension_numbers<[1], [0], [0], [1], [0, 0, 1, 1], [], []>} : vector<8x128xbf16>, vector<128x128xbf16>, vector<8x128xf32> -> vector<8x128xf32>
    %18 = arith.addf %8, %17 : vector<8x128xf32>
    %cst_12 = arith.constant 0.000000e+00 : f32
    %19 = vector.broadcast %cst_12 : f32 to vector<8x128xf32>
    %20 = arith.maximumf %18, %19 : vector<8x128xf32>
    %21 = arith.truncf %20 : vector<8x128xf32> to vector<8x128xbf16>
    %cst_13 = arith.constant dense<0.000000e+00> : vector<8x128xf32>
    %22 = tpu.matmul %21, %5, %cst_13 {dimension_numbers = #tpu.dot_dimension_numbers<[1], [0], [0], [1], [0, 0, 1, 1], [], []>} : vector<8x128xbf16>, vector<128x128xbf16>, vector<8x128xf32> -> vector<8x128xf32>
    %23 = arith.addf %8, %22 : vector<8x128xf32>
    %cst_14 = arith.constant 0.000000e+00 : f32
    %24 = vector.broadcast %cst_14 : f32 to vector<8x128xf32>
    %25 = arith.maximumf %23, %24 : vector<8x128xf32>
    %26 = arith.truncf %25 : vector<8x128xf32> to vector<8x128xbf16>
    %cst_15 = arith.constant dense<0.000000e+00> : vector<8x128xf32>
    %27 = tpu.matmul %26, %7, %cst_15 {dimension_numbers = #tpu.dot_dimension_numbers<[1], [0], [0], [1], [0, 0, 1, 1], [], []>} : vector<8x128xbf16>, vector<128x128xbf16>, vector<8x128xf32> -> vector<8x128xf32>
    %c0_16 = arith.constant 0 : index
    %c0_17 = arith.constant 0 : index
    %28 = vector.load %arg3[%c0_16, %c0_17] : memref<1x128xf32, #tpu.memory_space<vmem>>, vector<1x128xf32>
    %29 = vector.broadcast %28 : vector<1x128xf32> to vector<8x128xf32>
    %30 = arith.addf %27, %29 : vector<8x128xf32>
    %c0_18 = arith.constant 0 : index
    %c0_19 = arith.constant 0 : index
    %31 = vector.load %arg4[%c0_18, %c0_19] : memref<8x128xf32, #tpu.memory_space<vmem>>, vector<8x128xf32>
    tpu.vector_store %arg4[%c0_18, %c0_19], %30 {strides = array<i32>} : memref<8x128xf32, #tpu.memory_space<vmem>>, vector<8x128xf32>,
    return
  }
  func.func @transform_0(%arg0: i32) -> (i32, i32) {
    %c0_i32 = arith.constant 0 : i32
    %c0_i32_0 = arith.constant 0 : i32
    return %arg0, %c0_i32 : i32, i32
  }
  func.func @transform_1(%arg0: i32) -> (i32, i32, i32) {
    %c0_i32 = arith.constant 0 : i32
    %c0_i32_0 = arith.constant 0 : i32
    %c0_i32_1 = arith.constant 0 : i32
    %c0_i32_2 = arith.constant 0 : i32
    return %c0_i32, %c0_i32_0, %c0_i32_1 : i32, i32, i32
  }
  func.func @transform_2(%arg0: i32) -> (i32, i32) {
    %c0_i32 = arith.constant 0 : i32
    %c0_i32_0 = arith.constant 0 : i32
    %c0_i32_1 = arith.constant 0 : i32
    return %c0_i32, %c0_i32_0 : i32, i32
  }
  func.func @transform_3(%arg0: i32) -> (i32, i32) {
    %c0_i32 = arith.constant 0 : i32
    %c0_i32_0 = arith.constant 0 : i32
    return %arg0, %c0_i32 : i32, i32
  }
}

</mosaic_0001>

<bundles_post_ra>
// kernel: tpu_custom_call.1
= control target key start
LH: loop header
LB: loop body
LE: loop exit
PB: predicated region body
PF: predicated region fallthrough
CT: control target
= control target key end

     0   :  { %8 = vsyncpa [#allocation3], 0  ;;  %s885_s0 = inlined_call_operand.hbm [shape: f32[8,128], index: 0, kind: input, shape index: {}]   ;;  %s886_s1 = inlined_call_operand.hbm [shape: bf16[3,128,128], index: 1, kind: input, shape index: {}]   ;;  %s887_s2 = inlined_call_operand.vmem [shape: f32[1,128], index: 2, kind: input, shape index: {}]   ;;  %s888_s3 = inlined_call_operand.hbm [shape: f32[8,128], index: 3, kind: output, shape index: {}]  }
   0x1   :  { %9 = vsyncpa [#allocation6], 0 }
   0x2   :  { %10 = vsyncpa [#allocation4], 0  ;;  %s746_s12 = smov [#allocation2]   ;;  %s747_s14 = smov [#allocation5]  }
   0x3   :  { %s17_s13 = sshll.u32 %s746_s12, 4  ;;  %s26_s15 = sshll.u32 %s747_s14, 4  ;;  %s18_s13 = int_to_ptr.vmem [resolvable:$true] %s17_s13  ;;  %s773_s15 = int_to_ptr.vmem [resolvable:$true] %s26_s15 }
   0x4   :  { %s674_s18 = scalar_lea.hbm %s885_s0, 128 }
   0x5   :  { %p675_p0 = scmp.ne.s32.totalorder %s885_s0, %s674_s18  ;;  %p678_p1 = scmp.lt.u32.totalorder %s674_s18, %s885_s0 }
   0x7   :  { %p680_p2 = pnand %p678_p1, %p675_p0 }
   0x9   :  { %683 = shalt.err (!%p680_p2)
}
   0xa   :  { %s684_s23 = scalar_lea.vmem %s18_s13, 128  ;;  %p689_p4 = scmp.lt.s32.totalorder %s18_s13, %s18_s13 }
   0xb   :  { %p685_p3 = scmp.ne.s32.totalorder %s18_s13, %s684_s23  ;;  %p690_p5 = scmp.lt.s32.totalorder %s684_s23, %s684_s23 }
   0xd   :  { %p691_p6 = por %p690_p5, %p689_p4 }
   0xf   :  { %p692_p7 = pnand %p691_p6, %p685_p3 }
  0x11   :  { %695 = shalt.err (!%p692_p7)
}
  0x12   :  { %20 = dma.hbm_to_vmem [thread:$0]  %s885_s0, 128, %s18_s13, [#allocation3]  }
  0x13   :  { %s696_s28 = scalar_lea.hbm %s886_s1, 3072 }
  0x14   :  { %p697_p8 = scmp.ne.s32.totalorder %s886_s1, %s696_s28  ;;  %p700_p9 = scmp.lt.u32.totalorder %s696_s28, %s886_s1 }
  0x16   :  { %p702_p10 = pnand %p700_p9, %p697_p8 }
  0x18   :  { %705 = shalt.err (!%p702_p10)
}
  0x19   :  { %s706_s6 = scalar_lea.vmem %s773_s15, 3072  ;;  %p711_p12 = scmp.lt.s32.totalorder %s773_s15, %s773_s15 }
  0x1a   :  { %p707_p11 = scmp.ne.s32.totalorder %s773_s15, %s706_s6  ;;  %p712_p13 = scmp.lt.s32.totalorder %s706_s6, %s706_s6 }
  0x1c   :  { %p713_p0 = por %p712_p13, %p711_p12 }
  0x1e   :  { %p714_p1 = pnand %p713_p0, %p707_p11 }
  0x20   :  { %717 = shalt.err (!%p714_p1)
}
  0x21   :  { %s748_s0 = smov 64   ;;  %s749_s7 = smov 4  }
  0x22   :  { %32 = dma.hbm_to_vmem [thread:$0]  %s886_s1, 3072, %s773_s15, [#allocation6], %s748_s0, %s748_s0, %s749_s7  }
  0x23   :  { %740 = dma.done.wait [#allocation3], 128  }
  0x24   :  { %741 = vsyncadd [#allocation3], 4294967168 }
  0x25   :  { %742 = dma.done.wait [#allocation6], 3072  }
  0x26   :  { %743 = vsyncadd [#allocation6], 4294964224  ;;  %v750_v0 = vmov 0.0   ;;  %vm751_vm0 = vmmov 0   ;;  %v650_v1 = vld [vmem:[#allocation5] sm:$0xff]   ;;  %v651_v2 = vld [vmem:[#allocation5 + $0x8] sm:$0xff]  }
  0x27   :  { %543 = vmatprep.subr.bf16.mxu0 %v750_v0  ;;  %559 = vmatprep.mubr.msk.bf16.mxu0 %vm751_vm0, %v750_v0  ;;  %v652_v3 = vld [vmem:[#allocation5 + $0x10] sm:$0xff]   ;;  %v812_v4 = vld [vmem:[#allocation5 + $0x40] sm:$0xff]   ;;  %v653_v5 = vld [vmem:[#allocation5 + $0x18] sm:$0xff]   ;;  %s752_s11 = smov [#allocation7]  }
  0x28   :  { %563 = vmatprep.subr.bf16.mxu1 %v750_v0  ;;  %579 = vmatprep.mubr.msk.bf16.mxu1 %vm751_vm0, %v750_v0  ;;  %v816_v6 = vld [vmem:[#allocation5 + $0x48] sm:$0xff]   ;;  %v654_v7 = vld [vmem:[#allocation5 + $0x20] sm:$0xff]   ;;  %v660_v8 = vld [vmem:[#allocation5 + $0x50] sm:$0xff]   ;;  %s463_s12 = sshll.u32 %s752_s11, 4  ;;  %s464_s12 = int_to_ptr.vmem [resolvable:$true] %s463_s12 }
  0x29   :  { %544 = vmatpush3.bf16.msra.mxu0 %v650_v1  ;;  %564 = vmatpush3.bf16.msra.mxu1 %v812_v4  ;;  %v655_v9 = vld [vmem:[#allocation5 + $0x28] sm:$0xff]   ;;  %v661_v10 = vld [vmem:[#allocation5 + $0x58] sm:$0xff]   ;;  %v656_v11 = vld [vmem:[#allocation5 + $0x30] sm:$0xff]   ;;  %s718_s13 = scalar_lea.vmem %s464_s12, 128  ;;  %p723_p3 = scmp.lt.s32.totalorder %s464_s12, %s464_s12 }
  0x2a   :  { %545 = vmatprep.subr.bf16.mxu0 %v750_v0  ;;  %565 = vmatprep.subr.bf16.mxu1 %v750_v0  ;;  %v662_v12 = vld [vmem:[#allocation5 + $0x60] sm:$0xff]   ;;  %v657_v13 = vld [vmem:[#allocation5 + $0x38] sm:$0xff]   ;;  %v663_v15 = vld [vmem:[#allocation5 + $0x68] sm:$0xff]   ;;  %p719_p2 = scmp.ne.s32.totalorder %s464_s12, %s718_s13  ;;  %p724_p4 = scmp.lt.s32.totalorder %s718_s13, %s718_s13 }
  0x2b   :  { %v42_v14 = vld [vmem:[#allocation2] sm:$0xff]  ;;  %v664_v17 = vld [vmem:[#allocation5 + $0x70] sm:$0xff]   ;;  %v666_v32 = vld [vmem:[#allocation5 + $0x80] sm:$0xff]  }
  0x2c   :  { %v43_v16 = vpack.c.bf16 %v42_v14, %v42_v14  ;;  %v665_v18 = vld [vmem:[#allocation5 + $0x78] sm:$0xff]   ;;  %v667_v33 = vld [vmem:[#allocation5 + $0x88] sm:$0xff]   ;;  %v668_v34 = vld [vmem:[#allocation5 + $0x90] sm:$0xff]   ;;  %p725_p5 = por %p724_p4, %p723_p3 }
  0x2d   :  { %546 = vmatpush3.bf16.msra.mxu0 %v651_v2  ;;  %566 = vmatpush3.bf16.msra.mxu1 %v816_v6  ;;  %v669_v35 = vld [vmem:[#allocation5 + $0x98] sm:$0xff]   ;;  %v670_v36 = vld [vmem:[#allocation5 + $0xa0] sm:$0xff]   ;;  %v671_v37 = vld [vmem:[#allocation5 + $0xa8] sm:$0xff]  }
  0x2e   :  { %547 = vmatprep.subr.bf16.mxu0 %v750_v0  ;;  %567 = vmatprep.subr.bf16.mxu1 %v750_v0  ;;  %v672_v45 = vld [vmem:[#allocation5 + $0xb0] sm:$0xff]   ;;  %v673_v46 = vld [vmem:[#allocation5 + $0xb8] sm:$0xff]   ;;  %p726_p6 = pnand %p725_p5, %p719_p2 }
  0x2f   :  { %v489_v54 = vld [vmem:[%s887_s2] ss:$0 sm:$0xff] }
  0x31   :  { %548 = vmatpush3.bf16.msra.mxu0 %v652_v3  ;;  %568 = vmatpush3.bf16.msra.mxu1 %v660_v8 }
  0x32   :  { %549 = vmatprep.subr.bf16.mxu0 %v750_v0  ;;  %569 = vmatprep.subr.bf16.mxu1 %v750_v0 }
  0x35   :  { %550 = vmatpush3.bf16.msra.mxu0 %v653_v5  ;;  %570 = vmatpush3.bf16.msra.mxu1 %v661_v10 }
  0x36   :  { %551 = vmatprep.subr.bf16.mxu0 %v750_v0  ;;  %571 = vmatprep.subr.bf16.mxu1 %v750_v0 }
  0x39   :  { %552 = vmatpush3.bf16.msra.mxu0 %v654_v7  ;;  %572 = vmatpush3.bf16.msra.mxu1 %v662_v12 }
  0x3a   :  { %553 = vmatprep.subr.bf16.mxu0 %v750_v0  ;;  %573 = vmatprep.subr.bf16.mxu1 %v750_v0 }
  0x3d   :  { %554 = vmatpush3.bf16.msra.mxu0 %v655_v9  ;;  %574 = vmatpush3.bf16.msra.mxu1 %v663_v15 }
  0x3e   :  { %555 = vmatprep.subr.bf16.mxu0 %v750_v0  ;;  %575 = vmatprep.subr.bf16.mxu1 %v750_v0 }
  0x41   :  { %556 = vmatpush3.bf16.msra.mxu0 %v656_v11  ;;  %576 = vmatpush3.bf16.msra.mxu1 %v664_v17 }
  0x42   :  { %557 = vmatprep.subr.bf16.mxu0 %v750_v0  ;;  %577 = vmatprep.subr.bf16.mxu1 %v750_v0 }
  0x45   :  { %558 = vmatpush3.bf16.msra.mxu0 %v657_v13  ;;  %578 = vmatpush3.bf16.msra.mxu1 %v665_v18 }
  0x46   :  { %583 = vmatprep.subr.bf16.mxu0 %v750_v0  ;;  %603 = vmatprep.subr.bf16.mxu1 %v750_v0 }
  0x48   :  { %560 = vmatmul.mubr.bf16.vlgmr.msra.gmra.mrb[0].mxu0 %v43_v16 }
  0x49   :  { %584 = vmatpush3.bf16.msra.mxu0 %v812_v4  ;;  %599 = vmatprep.mubr.msk.bf16.mxu0 %vm751_vm0, %v750_v0 }
  0x4a   :  { %585 = vmatprep.subr.bf16.mxu0 %v750_v0 }
  0x4d   :  { %586 = vmatpush3.bf16.msra.mxu0 %v816_v6 }
  0x4e   :  { %587 = vmatprep.subr.bf16.mxu0 %v750_v0 }
  0x51   :  { %588 = vmatpush3.bf16.msra.mxu0 %v660_v8 }
  0x52   :  { %589 = vmatprep.subr.bf16.mxu0 %v750_v0 }
  0x55   :  { %590 = vmatpush3.bf16.msra.mxu0 %v661_v10 }
  0x56   :  { %591 = vmatprep.subr.bf16.mxu0 %v750_v0 }
  0x59   :  { %592 = vmatpush3.bf16.msra.mxu0 %v662_v12 }
  0x5a   :  { %593 = vmatprep.subr.bf16.mxu0 %v750_v0 }
  0x5d   :  { %594 = vmatpush3.bf16.msra.mxu0 %v663_v15 }
  0x5e   :  { %595 = vmatprep.subr.bf16.mxu0 %v750_v0 }
  0x61   :  { %596 = vmatpush3.bf16.msra.mxu0 %v664_v17 }
  0x62   :  { %597 = vmatprep.subr.bf16.mxu0 %v750_v0 }
  0x65   :  { %598 = vmatpush3.bf16.msra.mxu0 %v665_v18 }
  0x66   :  { %623 = vmatprep.subr.bf16.mxu0 %v750_v0 }
 0x11b   :  { %v844_v19 = vpop.f32.mrb[0].mxu0 }
 0x11c   :  { %v561_v20 = vpop.f32.mrb[1].mxu0  ;;  %v182_v21 = vmax.f32 %v844_v19, 0.0 }
 0x11d   :  { %v179_v22 = vpop.f32.mrb[2].mxu0 }
 0x11e   :  { %v562_v23 = vpop.f32.mrb[3].mxu0  ;;  %v183_v24 = vpack.c.bf16 %v182_v21, %v182_v21 }
 0x120   :  { %580 = vmatmul.mubr.bf16.vlgmr.msra.gmra.mrb[0].mxu1 %v183_v24 }
 0x121   :  { %604 = vmatpush3.bf16.msra.mxu1 %v812_v4  ;;  %619 = vmatprep.mubr.msk.bf16.mxu1 %vm751_vm0, %v750_v0 }
 0x122   :  { %605 = vmatprep.subr.bf16.mxu1 %v750_v0 }
 0x125   :  { %606 = vmatpush3.bf16.msra.mxu1 %v816_v6 }
 0x126   :  { %607 = vmatprep.subr.bf16.mxu1 %v750_v0 }
 0x129   :  { %608 = vmatpush3.bf16.msra.mxu1 %v660_v8 }
 0x12a   :  { %609 = vmatprep.subr.bf16.mxu1 %v750_v0 }
 0x12d   :  { %610 = vmatpush3.bf16.msra.mxu1 %v661_v10 }
 0x12e   :  { %611 = vmatprep.subr.bf16.mxu1 %v750_v0 }
 0x131   :  { %612 = vmatpush3.bf16.msra.mxu1 %v662_v12 }
 0x132   :  { %613 = vmatprep.subr.bf16.mxu1 %v750_v0 }
 0x135   :  { %614 = vmatpush3.bf16.msra.mxu1 %v663_v15 }
 0x136   :  { %615 = vmatprep.subr.bf16.mxu1 %v750_v0 }
 0x139   :  { %616 = vmatpush3.bf16.msra.mxu1 %v664_v17 }
 0x13a   :  { %617 = vmatprep.subr.bf16.mxu1 %v750_v0 }
 0x13d   :  { %618 = vmatpush3.bf16.msra.mxu1 %v665_v18 }
 0x1f3   :  { %v266_v25 = vpop.f32.mrb[0].mxu1 }
 0x1f4   :  { %v272_v26 = vadd.f32 %v266_v25, %v844_v19  ;;  %v581_v27 = vpop.f32.mrb[1].mxu1 }
 0x1f5   :  { %v269_v28 = vpop.f32.mrb[2].mxu1 }
 0x1f6   :  { %v273_v29 = vmax.f32 %v272_v26, 0.0  ;;  %v582_v30 = vpop.f32.mrb[3].mxu1 }
 0x1f8   :  { %v274_v31 = vpack.c.bf16 %v273_v29, %v273_v29 }
 0x1fa   :  { %600 = vmatmul.mubr.bf16.vlgmr.msra.gmra.mrb[4].mxu0 %v274_v31 }
 0x1fb   :  { %639 = vmatprep.mubr.msk.bf16.mxu0 %vm751_vm0, %v750_v0  ;;  %624 = vmatpush3.bf16.msra.mxu0 %v666_v32 }
 0x1fc   :  { %625 = vmatprep.subr.bf16.mxu0 %v750_v0 }
 0x1ff   :  { %626 = vmatpush3.bf16.msra.mxu0 %v667_v33 }
 0x200   :  { %627 = vmatprep.subr.bf16.mxu0 %v750_v0 }
 0x203   :  { %628 = vmatpush3.bf16.msra.mxu0 %v668_v34 }
 0x204   :  { %629 = vmatprep.subr.bf16.mxu0 %v750_v0 }
 0x207   :  { %630 = vmatpush3.bf16.msra.mxu0 %v669_v35 }
 0x208   :  { %631 = vmatprep.subr.bf16.mxu0 %v750_v0 }
 0x20b   :  { %632 = vmatpush3.bf16.msra.mxu0 %v670_v36 }
 0x20c   :  { %633 = vmatprep.subr.bf16.mxu0 %v750_v0 }
 0x20f   :  { %634 = vmatpush3.bf16.msra.mxu0 %v671_v37 }
 0x210   :  { %635 = vmatprep.subr.bf16.mxu0 %v750_v0 }
 0x213   :  { %636 = vmatpush3.bf16.msra.mxu0 %v672_v45 }
 0x214   :  { %637 = vmatprep.subr.bf16.mxu0 %v750_v0 }
 0x217   :  { %638 = vmatpush3.bf16.msra.mxu0 %v673_v46 }
 0x2cd   :  { %v309_v38 = vpop.f32.mrb[4].mxu0 }
 0x2ce   :  { %v315_v39 = vadd.f32 %v309_v38, %v844_v19  ;;  %v601_v40 = vpop.f32.mrb[5].mxu0 }
 0x2cf   :  { %v312_v41 = vpop.f32.mrb[6].mxu0 }
 0x2d0   :  { %v316_v42 = vmax.f32 %v315_v39, 0.0  ;;  %v602_v43 = vpop.f32.mrb[7].mxu0 }
 0x2d2   :  { %v317_v44 = vpack.c.bf16 %v316_v42, %v316_v42 }
 0x2d4   :  { %620 = vmatmul.mubr.bf16.vlgmr.msra.gmra.mrb[4].mxu1 %v317_v44 }
 0x3a7   :  { %v352_v47 = vpop.f32.mrb[4].mxu1 }
 0x3a8   :  { %v358_v48 = vadd.f32 %v352_v47, %v844_v19  ;;  %v621_v49 = vpop.f32.mrb[5].mxu1 }
 0x3a9   :  { %v355_v50 = vpop.f32.mrb[6].mxu1 }
 0x3aa   :  { %v359_v51 = vmax.f32 %v358_v48, 0.0  ;;  %v622_v52 = vpop.f32.mrb[7].mxu1 }
 0x3ac   :  { %v360_v53 = vpack.c.bf16 %v359_v51, %v359_v51 }
 0x3ae   :  { %640 = vmatmul.mubr.bf16.vlgmr.msra.gmra.mrb[8].mxu0 %v360_v53 }
 0x481   :  { %v450_v55 = vpop.f32.mrb[8].mxu0 }
 0x482   :  { %v451_v56 = vadd.f32 %v489_v54, %v450_v55  ;;  %v641_v57 = vpop.f32.mrb[9].mxu0 }
 0x483   :  { %v453_v58 = vpop.f32.mrb[10].mxu0 }
 0x484   :  { %456 = vst [vmem:[#allocation7] sm:$0xff] %v451_v56  ;;  %v642_v59 = vpop.f32.mrb[11].mxu0 }
 0x485   :  { %729 = shalt.err (!%p726_p6)
}
 0x486   :  { %s730_s2 = scalar_lea.hbm %s888_s3, 128 }
 0x487   :  { %p731_p7 = scmp.ne.s32.totalorder %s888_s3, %s730_s2  ;;  %p734_p8 = scmp.lt.u32.totalorder %s730_s2, %s888_s3 }
 0x489   :  { %p736_p9 = pnand %p734_p8, %p731_p7 }
 0x48b   :  { %739 = shalt.err (!%p736_p9)
}
 0x48c   :  { %466 = dma.vmem_to_hbm [thread:$0]  %s464_s12, 128, %s888_s3, [#allocation4]  }
 0x48d   :  { %744 = dma.done.wait [#allocation4], 128  }
 0x48e   :  { %745 = vsyncadd [#allocation4], 4294967168 }
 0x48f   :  { %470 = vsyncpa [#allocation3], 1 }
 0x490   :  { %471 = vsyncpa [#allocation6], 1 }
 0x491   :  { %472 = vsyncpa [#allocation4], 1 }

</bundles_post_ra>
